<compile_context>
chip_gen: v6e
topology: v6e:2x2x1
jax: 0.10.0
libtpu: 0.0.40
codegen_flags: <defaults>
</compile_context>

<pallas_src>
import functools

import jax
import jax.numpy as jnp
import numpy as np
from jax import lax
from jax.experimental import pallas as pl
from jax.experimental.pallas import tpu as pltpu

_LANES = 128
_NCORES = 2          # leading "parallel" grid axis (v7x has 2 TensorCores)


def _masked_l1_kernel(pred_ref, targ_ref, sum_ref, cnt_ref, acc_sum, acc_cnt,
                      *, block_rows, total_rows, steps_per_core):
    c = pl.program_id(0)          # core / parallel axis
    s = pl.program_id(1)          # sequential reduction axis

    @pl.when(s == 0)
    def _init():
        acc_sum[...] = jnp.zeros_like(acc_sum)
        acc_cnt[...] = jnp.zeros_like(acc_cnt)

    pred = pred_ref[...].astype(jnp.float32)
    targ = targ_ref[...].astype(jnp.float32)

    # Logical (un-clamped) global row id of every element in this block.
    # Rows >= total_rows correspond to the partial last block or to a
    # duplicate (clamped) block on the other core and must not contribute.
    blk = c * steps_per_core + s
    row = blk * block_rows + lax.broadcasted_iota(
        jnp.int32, (block_rows, _LANES), 0)
    valid = (row < total_rows) & (targ > 0.0)

    absdiff = jnp.abs(targ - pred)
    acc_sum[...] += jnp.where(valid, absdiff, 0.0)
    acc_cnt[...] += jnp.where(valid, 1.0, 0.0)

    # One-time cross-lane reduce + lane-dense write of this core's partials.
    @pl.when(s == pl.num_programs(1) - 1)
    def _finalize():
        sum_ref[...] = jnp.broadcast_to(jnp.sum(acc_sum[...]), sum_ref.shape)
        cnt_ref[...] = jnp.broadcast_to(jnp.sum(acc_cnt[...]), cnt_ref.shape)


def masked_l1_loss(pred, target, *, block_rows=1024):
    """MaskedL1Loss.forward(pred, target) -> scalar masked-mean L1 loss."""
    assert pred.shape == target.shape, "inconsistent dimensions"

    p = pred.reshape(-1)
    t = target.reshape(-1)
    n = p.shape[0]
    pad = (-n) % _LANES
    if pad:
        # minimal (<128 element) pad; padded target == 0 => never valid
        p = jnp.pad(p, (0, pad))
        t = jnp.pad(t, (0, pad))
    rows = (n + pad) // _LANES
    p2 = p.reshape(rows, _LANES)
    t2 = t.reshape(rows, _LANES)

    # Biggest legal block <= block_rows (sweep 512-2048); whole array if it fits.
    br = rows if rows <= block_rows else block_rows
    nblocks = -(-rows // br)
    steps = -(-nblocks // _NCORES)

    def in_map(c, s):
        blk = c * steps + s
        # clamp to a real block; duplicate reads are masked out in-kernel
        return (jnp.minimum(blk, nblocks - 1), 0)

    tile = pl.BlockSpec((br, _LANES), in_map)
    part_spec = pl.BlockSpec((1, 8, _LANES), lambda c, s: (c, 0, 0))
    part_shape = jax.ShapeDtypeStruct((_NCORES, 8, _LANES), jnp.float32)

    kernel = functools.partial(
        _masked_l1_kernel, block_rows=br, total_rows=rows,
        steps_per_core=steps)

    sums, cnts = pl.pallas_call(
        kernel,
        grid=(_NCORES, steps),
        in_specs=[tile, tile],
        out_specs=[part_spec, part_spec],
        out_shape=[part_shape, part_shape],
        scratch_shapes=[pltpu.VMEM((br, _LANES), jnp.float32),
                        pltpu.VMEM((br, _LANES), jnp.float32)],
        compiler_params=pltpu.CompilerParams(
            dimension_semantics=("parallel", "arbitrary")),
    )(p2, t2)

    total_sum = jnp.sum(sums[:, 0, 0])
    total_cnt = jnp.sum(cnts[:, 0, 0])
    # NaN when there is no valid element — matches torch.mean of empty tensor.
    return total_sum / total_cnt


# -------------------------- pure-JAX reference ------------------------------

def _ref(pred, target):
    valid = target > 0
    diff = jnp.abs(target - pred)
    return jnp.sum(jnp.where(valid, diff, 0.0)) / jnp.sum(
        valid.astype(jnp.float32))


# -------------------------- main --------------------------------------------

if __name__ == "__main__":
    key = jax.random.PRNGKey(0)
    kp, kt, kp2, kt2 = jax.random.split(key, 4)

    # small NCHW tensors; target mixes positive and non-positive entries
    shape = (2, 4, 16, 16)
    pred = jax.random.normal(kp, shape, dtype=jnp.float32)
    target = jax.random.uniform(kt, shape, dtype=jnp.float32,
                                minval=-0.5, maxval=1.0)

    out = jax.block_until_ready(masked_l1_loss(pred, target))
    ref = jax.block_until_ready(_ref(pred, target))
    if not np.allclose(np.asarray(out), np.asarray(ref), rtol=1e-4, atol=1e-5):
        raise AssertionError(f"mismatch: pallas={out} ref={ref}")

    # exercise the multi-block / two-core split with a smaller block size
    out_s = jax.block_until_ready(masked_l1_loss(pred, target, block_rows=8))
    if not np.allclose(np.asarray(out_s), np.asarray(ref), rtol=1e-4, atol=1e-5):
        raise AssertionError(f"mismatch (block_rows=8): pallas={out_s} ref={ref}")

    # exercise multi-step accumulation per core (several "arbitrary" steps)
    shape2 = (2, 4, 32, 32)
    pred2 = jax.random.normal(kp2, shape2, dtype=jnp.float32)
    target2 = jax.random.uniform(kt2, shape2, dtype=jnp.float32,
                                 minval=-0.5, maxval=1.0)
    out2 = jax.block_until_ready(masked_l1_loss(pred2, target2, block_rows=8))
    ref2 = jax.block_until_ready(_ref(pred2, target2))
    if not np.allclose(np.asarray(out2), np.asarray(ref2), rtol=1e-4, atol=1e-5):
        raise AssertionError(f"mismatch (multi-step): pallas={out2} ref={ref2}")

    print("KERNEL_OK")
</pallas_src>

<mosaic_0001>
module attributes {stable_mosaic.version = 11 : i64} {
  func.func @_masked_l1_kernel(%arg0: i32, %arg1: i32, %arg2: memref<16x128xf32, #tpu.memory_space<vmem>>, %arg3: memref<16x128xf32, #tpu.memory_space<vmem>>, %arg4: memref<1x8x128xf32, #tpu.memory_space<vmem>>, %arg5: memref<1x8x128xf32, #tpu.memory_space<vmem>>, %arg6: memref<16x128xf32, #tpu.memory_space<vmem>>, %arg7: memref<16x128xf32, #tpu.memory_space<vmem>>) attributes {dimension_semantics = [#tpu.dimension_semantics<parallel>, #tpu.dimension_semantics<arbitrary>], iteration_bounds = array<i64: 2, 1>, scalar_prefetch = 0 : i64, scratch_operands = 2 : i64, tpu.core_type = #tpu.core_type<tc>, window_params = [{transform_indices = @transform_0, window_bounds = array<i64: 16, 128>}, {transform_indices = @transform_1, window_bounds = array<i64: 16, 128>}, {transform_indices = @transform_2, window_bounds = array<i64: 1, 8, 128>}, {transform_indices = @transform_3, window_bounds = array<i64: 1, 8, 128>}]} {
    %c0_i32 = arith.constant 0 : i32
    %0 = arith.cmpi eq, %arg1, %c0_i32 : i32
    %1 = arith.extui %0 : i1 to i32
    %c0_i32_0 = arith.constant 0 : i32
    %2 = arith.cmpi ne, %1, %c0_i32_0 : i32
    scf.if %2 {
      %cst_18 = arith.constant 0.000000e+00 : f32
      %32 = vector.broadcast %cst_18 : f32 to vector<16x128xf32>
      %c0_19 = arith.constant 0 : index
      %c0_20 = arith.constant 0 : index
      %33 = vector.load %arg6[%c0_19, %c0_20] : memref<16x128xf32, #tpu.memory_space<vmem>>, vector<16x128xf32>
      tpu.vector_store %arg6[%c0_19, %c0_20], %32 {strides = array<i32>} : memref<16x128xf32, #tpu.memory_space<vmem>>, vector<16x128xf32>,
      %cst_21 = arith.constant 0.000000e+00 : f32
      %34 = vector.broadcast %cst_21 : f32 to vector<16x128xf32>
      %c0_22 = arith.constant 0 : index
      %c0_23 = arith.constant 0 : index
      %35 = vector.load %arg7[%c0_22, %c0_23] : memref<16x128xf32, #tpu.memory_space<vmem>>, vector<16x128xf32>
      tpu.vector_store %arg7[%c0_22, %c0_23], %34 {strides = array<i32>} : memref<16x128xf32, #tpu.memory_space<vmem>>, vector<16x128xf32>,
    } else {
    }
    %c0 = arith.constant 0 : index
    %c0_1 = arith.constant 0 : index
    %3 = vector.load %arg2[%c0, %c0_1] : memref<16x128xf32, #tpu.memory_space<vmem>>, vector<16x128xf32>
    %c0_2 = arith.constant 0 : index
    %c0_3 = arith.constant 0 : index
    %4 = vector.load %arg3[%c0_2, %c0_3] : memref<16x128xf32, #tpu.memory_space<vmem>>, vector<16x128xf32>
    %c1_i32 = arith.constant 1 : i32
    %5 = arith.muli %arg0, %c1_i32 : i32
    %6 = arith.addi %5, %arg1 : i32
    %c16_i32 = arith.constant 16 : i32
    %7 = arith.muli %6, %c16_i32 : i32
    %8 = tpu.iota {dimensions = array<i32: 0>} : vector<16x128xi32>
    %9 = vector.broadcast %7 : i32 to vector<16x128xi32>
    %10 = arith.addi %9, %8 : vector<16x128xi32>
    %c16_i32_4 = arith.constant 16 : i32
    %11 = vector.broadcast %c16_i32_4 : i32 to vector<16x128xi32>
    %12 = arith.cmpi slt, %10, %11 : vector<16x128xi32>
    %cst = arith.constant 0.000000e+00 : f32
    %13 = vector.broadcast %cst : f32 to vector<16x128xf32>
    %14 = arith.cmpf ogt, %4, %13 : vector<16x128xf32>
    %15 = arith.andi %12, %14 : vector<16x128xi1>
    %16 = arith.subf %4, %3 : vector<16x128xf32>
    %17 = math.absf %16 : vector<16x128xf32>
    %c0_5 = arith.constant 0 : index
    %c0_6 = arith.constant 0 : index
    %18 = vector.load %arg6[%c0_5, %c0_6] : memref<16x128xf32, #tpu.memory_space<vmem>>, vector<16x128xf32>
    %cst_7 = arith.constant 0.000000e+00 : f32
    %19 = vector.broadcast %cst_7 : f32 to vector<16x128xf32>
    %20 = arith.select %15, %17, %19 : vector<16x128xi1>, vector<16x128xf32>
    %21 = arith.addf %18, %20 : vector<16x128xf32>
    %c0_8 = arith.constant 0 : index
    %c0_9 = arith.constant 0 : index
    %22 = vector.load %arg6[%c0_8, %c0_9] : memref<16x128xf32, #tpu.memory_space<vmem>>, vector<16x128xf32>
    tpu.vector_store %arg6[%c0_8, %c0_9], %21 {strides = array<i32>} : memref<16x128xf32, #tpu.memory_space<vmem>>, vector<16x128xf32>,
    %c0_10 = arith.constant 0 : index
    %c0_11 = arith.constant 0 : index
    %23 = vector.load %arg7[%c0_10, %c0_11] : memref<16x128xf32, #tpu.memory_space<vmem>>, vector<16x128xf32>
    %cst_12 = arith.constant 1.000000e+00 : f32
    %cst_13 = arith.constant 0.000000e+00 : f32
    %24 = vector.broadcast %cst_12 : f32 to vector<16x128xf32>
    %25 = vector.broadcast %cst_13 : f32 to vector<16x128xf32>
    %26 = arith.select %15, %24, %25 : vector<16x128xi1>, vector<16x128xf32>
    %27 = arith.addf %23, %26 : vector<16x128xf32>
    %c0_14 = arith.constant 0 : index
    %c0_15 = arith.constant 0 : index
    %28 = vector.load %arg7[%c0_14, %c0_15] : memref<16x128xf32, #tpu.memory_space<vmem>>, vector<16x128xf32>
    tpu.vector_store %arg7[%c0_14, %c0_15], %27 {strides = array<i32>} : memref<16x128xf32, #tpu.memory_space<vmem>>, vector<16x128xf32>,
    %c0_i32_16 = arith.constant 0 : i32
    %29 = arith.cmpi eq, %arg1, %c0_i32_16 : i32
    %30 = arith.extui %29 : i1 to i32
    %c0_i32_17 = arith.constant 0 : i32
    %31 = arith.cmpi ne, %30, %c0_i32_17 : i32
    scf.if %31 {
      %c0_18 = arith.constant 0 : index
      %c0_19 = arith.constant 0 : index
      %32 = vector.load %arg6[%c0_18, %c0_19] : memref<16x128xf32, #tpu.memory_space<vmem>>, vector<16x128xf32>
      %33 = vector.shape_cast %32 : vector<16x128xf32> to vector<1x16x128xf32>
      %cst_20 = arith.constant dense<0.000000e+00> : vector<1xf32>
      %34 = vector.multi_reduction <add>, %33, %cst_20 [1, 2] : vector<1x16x128xf32> to vector<1xf32>
      %35 = vector.shape_cast %34 : vector<1xf32> to vector<1x1x1xf32>
      %36 = vector.extract %35[0, 0, 0] : f32 from vector<1x1x1xf32>
      %37 = vector.broadcast %36 : f32 to vector<1x8x128xf32>
      %c0_21 = arith.constant 0 : index
      %c0_22 = arith.constant 0 : index
      %c0_23 = arith.constant 0 : index
      %38 = vector.load %arg4[%c0_21, %c0_22, %c0_23] : memref<1x8x128xf32, #tpu.memory_space<vmem>>, vector<1x8x128xf32>
      tpu.vector_store %arg4[%c0_21, %c0_22, %c0_23], %37 {strides = array<i32>} : memref<1x8x128xf32, #tpu.memory_space<vmem>>, vector<1x8x128xf32>,
      %c0_24 = arith.constant 0 : index
      %c0_25 = arith.constant 0 : index
      %39 = vector.load %arg7[%c0_24, %c0_25] : memref<16x128xf32, #tpu.memory_space<vmem>>, vector<16x128xf32>
      %40 = vector.shape_cast %39 : vector<16x128xf32> to vector<1x16x128xf32>
      %cst_26 = arith.constant dense<0.000000e+00> : vector<1xf32>
      %41 = vector.multi_reduction <add>, %40, %cst_26 [1, 2] : vector<1x16x128xf32> to vector<1xf32>
      %42 = vector.shape_cast %41 : vector<1xf32> to vector<1x1x1xf32>
      %43 = vector.extract %42[0, 0, 0] : f32 from vector<1x1x1xf32>
      %44 = vector.broadcast %43 : f32 to vector<1x8x128xf32>
      %c0_27 = arith.constant 0 : index
      %c0_28 = arith.constant 0 : index
      %c0_29 = arith.constant 0 : index
      %45 = vector.load %arg5[%c0_27, %c0_28, %c0_29] : memref<1x8x128xf32, #tpu.memory_space<vmem>>, vector<1x8x128xf32>
      tpu.vector_store %arg5[%c0_27, %c0_28, %c0_29], %44 {strides = array<i32>} : memref<1x8x128xf32, #tpu.memory_space<vmem>>, vector<1x8x128xf32>,
    } else {
    }
    return
  }
  func.func @transform_0(%arg0: i32, %arg1: i32) -> (i32, i32) {
    %c1_i32 = arith.constant 1 : i32
    %0 = arith.muli %arg0, %c1_i32 : i32
    %1 = arith.addi %0, %arg1 : i32
    %c0_i32 = arith.constant 0 : i32
    %2 = arith.minsi %1, %c0_i32 : i32
    %c0_i32_0 = arith.constant 0 : i32
    %c0_i32_1 = arith.constant 0 : i32
    return %2, %c0_i32_0 : i32, i32
  }
  func.func @transform_1(%arg0: i32, %arg1: i32) -> (i32, i32) {
    %c1_i32 = arith.constant 1 : i32
    %0 = arith.muli %arg0, %c1_i32 : i32
    %1 = arith.addi %0, %arg1 : i32
    %c0_i32 = arith.constant 0 : i32
    %2 = arith.minsi %1, %c0_i32 : i32
    %c0_i32_0 = arith.constant 0 : i32
    %c0_i32_1 = arith.constant 0 : i32
    return %2, %c0_i32_0 : i32, i32
  }
  func.func @transform_2(%arg0: i32, %arg1: i32) -> (i32, i32, i32) {
    %c0_i32 = arith.constant 0 : i32
    %c0_i32_0 = arith.constant 0 : i32
    %c0_i32_1 = arith.constant 0 : i32
    return %arg0, %c0_i32, %c0_i32_0 : i32, i32, i32
  }
  func.func @transform_3(%arg0: i32, %arg1: i32) -> (i32, i32, i32) {
    %c0_i32 = arith.constant 0 : i32
    %c0_i32_0 = arith.constant 0 : i32
    %c0_i32_1 = arith.constant 0 : i32
    return %arg0, %c0_i32, %c0_i32_0 : i32, i32, i32
  }
}

</mosaic_0001>

<bundles_post_ra>
// kernel: tpu_custom_call.1
= control target key start
LH: loop header
LB: loop body
LE: loop exit
PB: predicated region body
PF: predicated region fallthrough
CT: control target
= control target key end

     0   :  { %9 = vsyncpa [#allocation5], 0  ;;  %s1092_s0 = inlined_call_operand.hbm [shape: f32[16,128], index: 0, kind: input, shape index: {}]   ;;  %s1093_s1 = inlined_call_operand.hbm [shape: f32[16,128], index: 1, kind: input, shape index: {}]   ;;  %s1094_s2 = inlined_call_operand.hbm [shape: f32[2,8,128], index: 2, kind: output, shape index: {0}]   ;;  %s1095_s3 = inlined_call_operand.hbm [shape: f32[2,8,128], index: 3, kind: output, shape index: {1}]  }
   0x1   :  { %11 = vsyncpa [#allocation5 + $0x1], 0 }
   0x2   :  { %12 = vsyncpa [#allocation8], 0 }
   0x3   :  { %14 = vsyncpa [#allocation8 + $0x1], 0 }
   0x4   :  { %15 = vsyncpa [#allocation6], 0 }
   0x5   :  { %17 = vsyncpa [#allocation6 + $0x1], 0 }
   0x6   :  { %18 = vsyncpa [#allocation11], 0 }
   0x7   :  { %20 = vsyncpa [#allocation11 + $0x1], 0  ;;  %s867_s12 = smov 0   ;;  %s869_s13 = smov 0  }
   0x8   :  { %s871_s14 = smov 0   ;;  %s873_s15 = smov 0  }
   0x9   :  { %s875_s16 = smov 0   ;;  %s877_s17 = smov 0  }
   0xa   :  { %s879_s18 = smov 0   ;;  %s881_s19 = smov 0  }
   0xb LB: > { %s520_s20 = sadd.s32 4294967295, %s838_s19   ;;  %s521_s21 = sadd.s32 4294967294, %s838_s19   ;;  %s838_s19 = sphi %s881_s19, %s26_s19   ;;  %s834_s18 = sphi %s879_s18, %s1114_s18   ;;  %s830_s17 = sphi %s877_s17, %s1113_s17   ;;  %s826_s16 = sphi %s875_s16, %s1082_s16   ;;  %s822_s15 = sphi %s873_s15, %s1112_s15   ;;  %s818_s14 = sphi %s871_s14, %s1111_s14   ;;  %s814_s13 = sphi %s869_s13, %s1110_s13   ;;  %s810_s12 = sphi %s867_s12, %s1109_s12  }
   0xc   : > { %s38_s22 = sadd.s32 1, %s834_s18  ;;  %p807_p1 = scmp.ne.s32.totalorder %s826_s16, 0 }
   0xd   : > { %p40_p0 = scmp.ge.s32.totalorder %s38_s22, 2  ;;  %p59_p2 = scmp.eq.s32.totalorder %s838_s19, 0 }
   0xe   : > { %p64_p3 = scmp.ne.s32.totalorder %s826_s16, %s822_s15  ;;  %p65_p5 = scmp.eq.s32.totalorder %s520_s20, 0 }
   0xf   : > { %s1116_s22 = smov (%p40_p0, %s38_s22), 0  ;;  %p913_p4 = por %p807_p1, %p59_p2 }
  0x10   : > { %p917_p6 = por %p65_p5, %p64_p3  ;;  %s106_s25 = ssub.s32 %s834_s18, %s1116_s22 }
  0x11   : > { %p107_p7 = scmp.eq.s32.totalorder %s106_s25, 0  ;;  %s109_s26 = sadd.s32 1, %s818_s14 }
  0x12   : > { %s1099_s24 = scalar_select %p917_p6, 1, 0 }
  0x13   : > { %s925_s27 = scalar_select %p107_p7, %s818_s14, %s109_s26  }
  0x14   : > { %p119_p8 = scmp.ne.s32.totalorder %s818_s14, %s814_s13  ;;  %p120_p9 = scmp.eq.s32.totalorder %s520_s20, 1 }
  0x15   : > { %p125_p10 = scmp.ne.s32.totalorder %s814_s13, %s810_s12  ;;  %p126_p11 = scmp.eq.s32.totalorder %s521_s21, 1 }
  0x16   : > { %p931_p12 = por %p120_p9, %p119_p8  ;;  %p570_p1 = scmp.lt.s32.totalorder %s838_s19, 2 }
  0x17   : > { %p936_p0 = por %p126_p11, %p125_p10  ;;  %s840_s30 = smov [#allocation4]  }
  0x18   : > { %s1100_s28 = scalar_select %p931_p12, 1, 0 }
  0x19   : > { %s1101_s29 = scalar_select %p936_p0, 1, 0 }
  0x1a   : > { %s186_s4 = sshll.u32 %s840_s30, 4  ;;  %p943_p2 = pnand %p570_p1, %p913_p4  ;;  %s187_s4 = int_to_ptr.vmem [resolvable:$true] %s186_s4 }
  0x1b   : > { %s647_s8 = scalar_lea.hbm %s1092_s0, 256 }
  0x1c   : > { %p648_p3 = scmp.ne.s32.totalorder %s1092_s0, %s647_s8  ;;  %p649_p5 = pneg %p943_p2 }
  0x1d   : > { %p654_p8 = scmp.lt.s32.totalorder %s647_s8, %s647_s8 }
  0x1e   : > { %p650_p7 = pnand %p649_p5, %p648_p3 }
  0x20   : > { %p651_p4 = pneg %p650_p7 }
  0x22   : > { %p656_p9 = pnand %p654_p8, %p651_p4 }
  0x24   : > { %659 = shalt.err (!%p656_p9)
}
  0x25   : > { %s660_s11 = scalar_lea.vmem %s187_s4, 256  ;;  %s667_s15 = scalar_lea.vmem %s187_s4, 512 }
  0x26   : > { %p661_p10 = scmp.ne.s32.totalorder %s187_s4, %s660_s11  ;;  %p668_p13 = scmp.lt.s32.totalorder %s187_s4, %s187_s4 }
  0x27   : > { %p669_p0 = scmp.lt.s32.totalorder %s667_s15, %s660_s11 }
  0x28   : > { %p663_p11 = pnand %p661_p10, %p649_p5 }
  0x29   : > { %p670_p12 = por %p669_p0, %p668_p13 }
  0x2a   : > { %p664_p1 = pneg %p663_p11 }
  0x2c   : > { %p671_p6 = pnand %p670_p12, %p664_p1 }
  0x2e   : > { %674 = shalt.err (!%p671_p6)
}
  0x2f   : > { %s841_s20 = smov 128   ;;  %s842_s21 = smov 8  }
  0x30   : > { %559 = dma.hbm_to_vmem [thread:$0]  (!%p943_p2), %s1092_s0, 256, %s187_s4, [#allocation5], %s841_s20, %s841_s20, %s842_s21  }
  0x31   : > { %p530_p3 = scmp.ge.s32.totalorder %s838_s19, 1  ;;  %p218_p7 = scmp.lt.s32.totalorder %s838_s19, 3 }
  0x32   : > { %s843_s30 = smov [#allocation7]   ;;  %s675_s9 = scalar_lea.hbm %s1093_s1, 256 }
  0x33   : > { %p968_p4 = pnand %p530_p3, %p218_p7  ;;  %s210_s6 = sshll.u32 %s843_s30, 4  ;;  %s211_s6 = int_to_ptr.vmem [resolvable:$true] %s210_s6 }
  0x34   : > { %p676_p6 = scmp.ne.s32.totalorder %s1093_s1, %s675_s9  ;;  %p682_p0 = scmp.lt.s32.totalorder %s675_s9, %s675_s9 }
  0x35   : > { %s1103_s26 = scalar_select %p968_p4, 1, 0 }
  0x36   : > { %p678_p12 = pnand %p676_p6, %p649_p5 }
  0x38   : > { %p679_p13 = pneg %p678_p12 }
  0x3a   : > { %p684_p8 = pnand %p682_p0, %p679_p13 }
  0x3c   : > { %687 = shalt.err (!%p684_p8)
}
  0x3d   : > { %s688_s4 = scalar_lea.vmem %s211_s6, 256  ;;  %s695_s15 = scalar_lea.vmem %s211_s6, 512 }
  0x3e   : > { %p689_p9 = scmp.ne.s32.totalorder %s211_s6, %s688_s4  ;;  %p696_p1 = scmp.lt.s32.totalorder %s211_s6, %s211_s6 }
  0x3f   : > { %p697_p3 = scmp.lt.s32.totalorder %s695_s15, %s688_s4 }
  0x40   : > { %p691_p10 = pnand %p689_p9, %p649_p5 }
  0x41   : > { %p698_p7 = por %p697_p3, %p696_p1 }
  0x42   : > { %p692_p11 = pneg %p691_p10 }
  0x44   : > { %p699_p4 = pnand %p698_p7, %p692_p11 }
  0x46   : > { %702 = shalt.err (!%p699_p4)
}
  0x47   : > { %562 = dma.hbm_to_vmem [thread:$0]  (!%p943_p2), %s1093_s1, 256, %s211_s6, [#allocation8], %s841_s20, %s841_s20, %s842_s21  }
  0x48   : > { %p1104_p6 = scmp.ne.s32.totalorder %s1103_s26, 0 }
  0x49   : > { %s224_s30 = sand.u32 (!%p1104_p6), 1, %s826_s16   ;;  %p1105_p5 = scmp.ne.s32.totalorder (!%p1104_p6), %s1099_s24, 0 }
  0x4a   : > { %222 = sbr.rel (%p1104_p6) target bundleno = 332 (0x14c), region = 28  ;;  %s531_s7 = sshll.u32 (!%p1104_p6), %s224_s30, 4 }
  0x4b   : > { %s225_s8 = scalar_lea.sflag (!%p1104_p6), [#allocation5], %s224_s30  ;;  %s228_s9 = scalar_lea.vmem (!%p1104_p6), [#allocation4], %s531_s7 }
  0x4f   : > { %792 = dma.done.wait (%p1105_p5), %s225_s8, 256  }
  0x50   : > { %794 = vsyncadd (%p1105_p5), %s225_s8, 4294967040  ;;  %s234_s5 = scalar_lea.sflag [#allocation8], %s224_s30  ;;  %s237_s10 = scalar_lea.vmem [#allocation7], %s531_s7 }
  0x51   : > { %796 = dma.done.wait (%p1105_p5), %s234_s5, 256  }
  0x52   : > { %798 = vsyncadd (%p1105_p5), %s234_s5, 4294967040  ;;  %s535_s20 = sshll.u32 %s830_s17, 4  ;;  %v292_v0 = vlaneseq  ;;  %v286_v6 = vld [vmem:[%s228_s9] sm:$0xff]  ;;  %v287_v7 = vld [vmem:[%s228_s9 + $0x8] sm:$0xff]  ;;  %v844_v16 = vmov 0.0   ;;  %s1002_s24 = sand.u32 1, %s814_s13  }
  0x53   : > { %v295_v1 = vstv %s535_s20  ;;  %v288_v8 = vld [vmem:[%s237_s10] sm:$0xff]  ;;  %v289_v9 = vld [vmem:[%s237_s10 + $0x8] sm:$0xff]  ;;  %s533_s21 = sshll.u32 %s1002_s24, 3  ;;  %s538_s26 = sshll.u32 %s830_s17, 7 }
  0x54   : > { %v293_v2 = vshrl.u32 %v292_v0, 7  ;;  %vm300_vm2 = vcmp.gt.f32.partialorder %v288_v8, 0.0  ;;  %v304_v10 = vsub.f32 %v288_v8, %v286_v6  ;;  %vm301_vm3 = vcmp.gt.f32.partialorder %v289_v9, 0.0  ;;  %s262_s6 = scalar_lea.vmem [#allocation9], %s533_s21  ;;  %s1006_s4 = scalar_lea.vmem [#allocation10], %s533_s21 }
  0x55   : > { %v305_v11 = vsub.f32 %v289_v9, %v287_v7  ;;  %s374_s11 = sshll.u32 %s262_s6, 4  ;;  %s387_s15 = sshll.u32 %s1006_s4, 4  ;;  %s1016_s11 = int_to_ptr.vmem [resolvable:$true] %s374_s11  ;;  %s1018_s15 = int_to_ptr.vmem [resolvable:$true] %s387_s15 }
  0x56   : > { %v294_v3 = vadd.s32 8, %v293_v2  ;;  %v296_v4 = vadd.s32 %v295_v1, %v293_v2  ;;  %v306_v12 = vand.u32 2147483647, %v304_v10  ;;  %s1014_s30 = scalar_lea.hbm %s1094_s2, %s538_s26  ;;  %s356_s8 = scalar_lea.sflag [#allocation6], %s1002_s24 }
  0x57   : > { %v307_v13 = vand.u32 2147483647, %v305_v11  ;;  %s703_s9 = scalar_lea.vmem %s1016_s11, 128  ;;  %p1106_p4 = scmp.ne.s32.totalorder %s1100_s28, 0 }
  0x58   : > { %v297_v5 = vadd.s32 %v295_v1, %v294_v3  ;;  %vm298_vm0 = vcmp.lt.s32.totalorder %v296_v4, 16  ;;  %p704_p2 = scmp.ne.s32.totalorder %s1016_s11, %s703_s9  ;;  %s845_s5 = smov [#allocation9]  }
  0x59   : > { %vm302_vm4 = vmand %vm298_vm0, %vm300_vm2  ;;  %s707_s10 = sshll.u32 %s845_s5, 4  ;;  %s708_s10 = int_to_ptr.vmem [resolvable:$false] %s707_s10 }
  0x5a   : > { %vm299_vm1 = vcmp.lt.s32.totalorder %v297_v5, 16  ;;  %v310_v14 = vsel %vm302_vm4, %v306_v12, 0.0  ;;  %v318_v17 = vsel %vm302_vm4, 1.0, %v844_v16  ;;  %p705_p12 = pnand %p704_p2, %p1106_p4  ;;  %s709_s20 = scalar_lea.vmem %s708_s10, 256 }
  0x5b   : > { %vm303_vm5 = vmand %vm299_vm1, %vm301_vm3  ;;  %p710_p0 = scmp.lt.s32.totalorder %s1016_s11, %s708_s10  ;;  %p711_p8 = scmp.lt.s32.totalorder %s709_s20, %s703_s9 }
  0x5c   : > { %v311_v15 = vsel %vm303_vm5, %v307_v13, 0.0  ;;  %v319_v18 = vsel %vm303_vm5, 1.0, %v844_v16  ;;  %p706_p13 = pneg %p705_p12 }
  0x5d   : > { %v329_v19 = vadd.f32 %v311_v15, %v310_v14  ;;  %v343_v20 = vadd.f32 %v319_v18, %v318_v17  ;;  %p712_p9 = por %p711_p8, %p710_p0 }
  0x5f   : > { %330 = vadd.xlane.f32.xlu0 %v329_v19  ;;  %p713_p10 = pnand %p712_p9, %p706_p13 }
  0x63   : > { %344 = vadd.xlane.f32.xlu0 %v343_v20 }
  0xe8   : > { %v331_v21 = vpop.xlane.xlu0 %330 }
  0xe9   : > { %v332_v22 = vrot.slane %v331_v21, 4 }
  0xeb   : > { %v333_v23 = vadd.f32 %v332_v22, %v331_v21 }
  0xec   : > { %v345_v24 = vpop.xlane.xlu0 %344 }
  0xed   : > { %v334_v25 = vrot.slane %v333_v23, 2  ;;  %v346_v26 = vrot.slane %v345_v24, 4 }
  0xef   : > { %v347_v27 = vadd.f32 %v346_v26, %v345_v24  ;;  %v335_v28 = vadd.f32 %v334_v25, %v333_v23 }
  0xf1   : > { %v348_v29 = vrot.slane %v347_v27, 2  ;;  %v336_v30 = vrot.slane %v335_v28, 1 }
  0xf3   : > { %v349_v31 = vadd.f32 %v348_v29, %v347_v27  ;;  %v337_v32 = vadd.f32 %v336_v30, %v335_v28 }
  0xf5   : > { %544 = vpush %v337_v32  ;;  %v350_v33 = vrot.slane %v349_v31, 1 }
  0xf7   : > { %v351_v34 = vadd.f32 %v350_v33, %v349_v31 }
  0xf9   : > { %546 = vpush %v351_v34 }
 0x126   : > { %s545_s7 = spop %544 }
 0x127   : > { %v339_v35 = vstv %s545_s7 }
 0x128   : > { %340 = vst [vmem:[%s262_s6] sm:$0xff] %v339_v35 }
 0x129   : > { %716 = shalt.err (!%p713_p10)
}
 0x12a   : > { %s717_s21 = scalar_lea.hbm %s1014_s30, 128  ;;  %s721_s25 = scalar_lea.hbm %s1094_s2, 256 }
 0x12b   : > { %p718_p11 = scmp.ne.s32.totalorder %s1014_s30, %s717_s21  ;;  %p722_p7 = scmp.lt.s32.totalorder %s1014_s30, %s1094_s2 }
 0x12c   : > { %p723_p6 = scmp.lt.s32.totalorder %s721_s25, %s717_s21 }
 0x12d   : > { %p719_p1 = pnand %p718_p11, %p1106_p4 }
 0x12e   : > { %p724_p5 = por %p723_p6, %p722_p7 }
 0x12f   : > { %p720_p3 = pneg %p719_p1 }
 0x131   : > { %p725_p2 = pnand %p724_p5, %p720_p3 }
 0x133   : > { %728 = shalt.err (!%p725_p2)
}
 0x134   : > { %552 = dma.vmem_to_hbm [thread:$0]  (%p1106_p4), %s1016_s11, 128, %s1014_s30, %s356_s8  }
 0x135   : > { %s547_s9 = spop %546  ;;  %s385_s21 = scalar_lea.hbm %s1095_s3, %s538_s26 }
 0x136   : > { %v353_v36 = vstv %s547_s9  ;;  %s361_s6 = scalar_lea.sflag [#allocation11], %s1002_s24  ;;  %s729_s23 = scalar_lea.vmem %s1018_s15, 128 }
 0x137   : > { %354 = vst [vmem:[%s1006_s4] sm:$0xff] %v353_v36  ;;  %p730_p12 = scmp.ne.s32.totalorder %s1018_s15, %s729_s23  ;;  %s846_s25 = smov [#allocation10]  }
 0x138   : > { %s733_s7 = sshll.u32 %s846_s25, 4  ;;  %s734_s7 = int_to_ptr.vmem [resolvable:$false] %s733_s7 }
 0x139   : > { %p731_p13 = pnand %p730_p12, %p1106_p4  ;;  %s735_s5 = scalar_lea.vmem %s734_s7, 256 }
 0x13a   : > { %p736_p8 = scmp.lt.s32.totalorder %s1018_s15, %s734_s7  ;;  %p737_p9 = scmp.lt.s32.totalorder %s735_s5, %s729_s23 }
 0x13b   : > { %p732_p0 = pneg %p731_p13 }
 0x13c   : > { %p738_p10 = por %p737_p9, %p736_p8 }
 0x13e   : > { %p739_p11 = pnand %p738_p10, %p732_p0 }
 0x140   : > { %742 = shalt.err (!%p739_p11)
}
 0x141   : > { %s743_s17 = scalar_lea.hbm %s385_s21, 128  ;;  %s747_s11 = scalar_lea.hbm %s1095_s3, 256 }
 0x142   : > { %p744_p1 = scmp.ne.s32.totalorder %s385_s21, %s743_s17  ;;  %p748_p6 = scmp.lt.s32.totalorder %s385_s21, %s1095_s3 }
 0x143   : > { %p749_p5 = scmp.lt.s32.totalorder %s747_s11, %s743_s17 }
 0x144   : > { %p745_p3 = pnand %p744_p1, %p1106_p4 }
 0x145   : > { %p750_p2 = por %p749_p5, %p748_p6 }
 0x146   : > { %p746_p7 = pneg %p745_p3 }
 0x148   : > { %p751_p12 = pnand %p750_p2, %p746_p7 }
 0x14a   : > { %754 = shalt.err (!%p751_p12)
}
 0x14b   : > { %553 = dma.vmem_to_hbm [thread:$0]  (%p1106_p4), %s1018_s15, 128, %s385_s21, %s361_s6  }
 0x14c PF: > { %s399_s8 = sand.u32 1, %s810_s12   ;;  %p1107_p13 = scmp.ne.s32.totalorder %s1101_s29, 0 }
 0x14d   : > { %p1108_p0 = scmp.ge.s32.totalorder %s838_s19, 2  ;;  %s400_s9 = scalar_lea.sflag [#allocation6], %s399_s8 }
 0x14f   : > { %p564_p8 = pnand %p1108_p0, %p1107_p13 }
 0x151   : > { %p565_p9 = pneg %p564_p8 }
 0x153   : > { %800 = dma.done.wait (%p565_p9), %s400_s9, 128  }
 0x154   : > { %802 = vsyncadd (%p565_p9), %s400_s9, 4294967168  ;;  %s409_s10 = scalar_lea.sflag [#allocation11], %s399_s8 }
 0x155   : > { %804 = dma.done.wait (%p565_p9), %s409_s10, 128  }
 0x156   : > { %806 = vsyncadd (%p565_p9), %s409_s10, 4294967168  ;;  %s26_s19 = sadd.s32 1, %s838_s19   ;;  %s1109_s12 = smov %s814_s13 }
 0x157   : > { %p23_p10 = scmp.ge.s32.totalorder %s26_s19, 4   ;;  %s1110_s13 = smov %s818_s14 }
 0x158   : > { %s1111_s14 = smov %s925_s27  ;;  %s1112_s15 = smov %s826_s16 }
 0x159   : > { %s1082_s16 = smov 0   ;;  %s1113_s17 = smov %s834_s18 }
 0x15a   : > { %s1114_s18 = smov %s1116_s22  ;;  %25 = sbr.rel (!%p23_p10) target bundleno = 11 (0xb), region = 111 }
 0x15f   :  { %414 = vsyncpa [#allocation5], 1 }
 0x160   :  { %416 = vsyncpa [#allocation5 + $0x1], 1 }
 0x161   :  { %417 = vsyncpa [#allocation8], 1 }
 0x162   :  { %419 = vsyncpa [#allocation8 + $0x1], 1 }
 0x163   :  { %420 = vsyncpa [#allocation6], 1 }
 0x164   :  { %422 = vsyncpa [#allocation6 + $0x1], 1 }
 0x165   :  { %423 = vsyncpa [#allocation11], 1 }
 0x166   :  { %425 = vsyncpa [#allocation11 + $0x1], 1 }

</bundles_post_ra>
